<compile_context>
chip_gen: v5e
topology: v5e:2x2
jax: 0.10.0
libtpu: 0.0.40
codegen_flags: <defaults>
</compile_context>

<pallas_src>
import math

import jax
import jax.numpy as jnp
from jax.experimental import pallas as pl
from jax.experimental.pallas import tpu as pltpu


def _square_kernel(var_ref, out_ref):
    # Elementwise hot path: pow(var, 2) on the VPU (1 vld + 1 vmul + 1 vst per vreg).
    v = var_ref[...]
    out_ref[...] = v * v


def _sublane_multiple(dtype):
    # f32 -> 8, bf16/f16 -> 16, int8/fp8 -> 32 (sub-32-bit dtypes pack sublanes).
    itemsize = jnp.dtype(dtype).itemsize
    return 8 * max(1, 4 // itemsize)


def _lane_dense_2d(shape):
    """Flatten an arbitrary parameter shape to a lane-dense (rows, cols) view."""
    if len(shape) == 2:
        return int(shape[0]), int(shape[1])
    total = int(math.prod(shape)) if len(shape) else 1
    if total == 0:
        return 0, 1
    if total % 128 == 0:
        cols = 128
        # Widen lanes (up to 16K) while the width still divides the element count:
        # keeps every DMA rectangular and every output store a full unmasked vst.
        while cols * 2 <= min(total, 16384) and total % (cols * 2) == 0:
            cols *= 2
        return total // cols, cols
    if len(shape) >= 1 and int(shape[-1]) > 0:
        last = int(shape[-1])
        return total // last, last
    return 1, total


def one_var_forward(var, *, target_block_bytes=4 * 1024 * 1024,
                    single_block_bytes=512 * 1024):
    """Pallas implementation of OneVarModule.forward(): returns var ** 2."""
    orig_shape = var.shape
    rows, cols = _lane_dense_2d(orig_shape)
    if rows * cols == 0:
        return var * var  # empty parameter: nothing to launch

    v2 = var.reshape(rows, cols)
    itemsize = jnp.dtype(var.dtype).itemsize
    total = rows * cols
    total_bytes = total * itemsize
    cost = pl.CostEstimate(flops=total, transcendentals=0,
                           bytes_accessed=2 * total_bytes)

    # ---- Fast path: tiny parameter -> single whole-array VMEM block, no grid. ----
    if total_bytes <= single_block_bytes:
        out = pl.pallas_call(
            _square_kernel,
            out_shape=jax.ShapeDtypeStruct((rows, cols), var.dtype),
            in_specs=[pl.BlockSpec(memory_space=pltpu.MemorySpace.VMEM)],
            out_specs=pl.BlockSpec(memory_space=pltpu.MemorySpace.VMEM),
            cost_estimate=cost,
        )(v2)
        return out.reshape(orig_shape)

    # ---- Tiled path: biggest lane-dense tile within the per-buffer budget. ----
    sub = _sublane_multiple(var.dtype)
    budget = target_block_bytes

    # Column (lane) tiling.
    if cols <= 128 or cols * sub * itemsize <= budget:
        block_cols = cols
    else:
        cand = max(128, (budget // (sub * itemsize)) // 128 * 128)
        cand = max(128, min(cand, (cols // 128) * 128))
        block_cols = cand
        # Prefer a width that divides cols (unmasked last column block), but never
        # shrink the tile by more than 2x for it.
        c = cand
        floor_c = max(128, cand // 2)
        while c >= floor_c:
            if cols % c == 0:
                block_cols = c
                break
            c -= 128

    # Row (sublane) tiling: fill the remaining byte budget (max_rows is computed
    # AFTER block_cols is fixed, so the tile can never exceed the budget).
    max_rows = max(sub, (budget // (block_cols * itemsize)) // sub * sub)
    block_rows = min(rows, max_rows)

    # Expose >=2 "parallel" blocks so v7x's two TensorCores both move HBM traffic
    # (near-free on single-core v5e/v6e).
    grid_r = pl.cdiv(rows, block_rows)
    grid_c = pl.cdiv(cols, block_cols)
    if grid_r * grid_c < 2:
        if rows >= 2 * sub:
            half = (pl.cdiv(rows, 2) + sub - 1) // sub * sub
            block_rows = min(block_rows, max(sub, half))
        elif cols >= 2 * 128:
            half_c = (pl.cdiv(cols, 2) + 127) // 128 * 128
            block_cols = min(block_cols, max(128, half_c))
        grid_r = pl.cdiv(rows, block_rows)
        grid_c = pl.cdiv(cols, block_cols)

    out = pl.pallas_call(
        _square_kernel,
        out_shape=jax.ShapeDtypeStruct((rows, cols), var.dtype),
        grid=(grid_r, grid_c),
        in_specs=[pl.BlockSpec((block_rows, block_cols), lambda i, j: (i, j))],
        out_specs=pl.BlockSpec((block_rows, block_cols), lambda i, j: (i, j)),
        compiler_params=pltpu.CompilerParams(
            dimension_semantics=("parallel", "parallel"),
            vmem_limit_bytes=48 * 1024 * 1024,
        ),
        cost_estimate=cost,
    )(v2)
    return out.reshape(orig_shape)


if __name__ == "__main__":
    key = jax.random.PRNGKey(0)

    # Small parameter (the shape OneVarModule would be built with in the test):
    # exercises the no-grid fast path.
    param_value = jax.random.normal(key, (8, 128), dtype=jnp.float32)
    out = jax.block_until_ready(one_var_forward(param_value))
    ref = param_value ** 2
    assert out.shape == ref.shape and out.dtype == ref.dtype
    assert jnp.allclose(out, ref, atol=1e-6, rtol=1e-6)

    # Slightly larger parameter with reduced budgets -> exercises the tiled
    # (gridded) path with >=2 parallel blocks while keeping the shape small.
    key2 = jax.random.fold_in(key, 1)
    param_big = jax.random.normal(key2, (64, 256), dtype=jnp.float32)
    out_big = jax.block_until_ready(
        one_var_forward(param_big, target_block_bytes=16 * 1024,
                        single_block_bytes=8 * 1024)
    )
    ref_big = param_big ** 2
    assert out_big.shape == ref_big.shape and out_big.dtype == ref_big.dtype
    assert jnp.allclose(out_big, ref_big, atol=1e-6, rtol=1e-6)

    # 1-D (bias-like, not a 128 multiple) and 3-D parameters exercise the
    # flatten-to-lane-dense path.
    key3 = jax.random.fold_in(key, 2)
    param_1d = jax.random.normal(key3, (300,), dtype=jnp.float32)
    out_1d = jax.block_until_ready(one_var_forward(param_1d))
    assert out_1d.shape == param_1d.shape
    assert jnp.allclose(out_1d, param_1d ** 2, atol=1e-6, rtol=1e-6)

    key4 = jax.random.fold_in(key, 3)
    param_3d = jax.random.normal(key4, (2, 4, 64), dtype=jnp.float32)
    out_3d = jax.block_until_ready(one_var_forward(param_3d))
    assert out_3d.shape == param_3d.shape
    assert jnp.allclose(out_3d, param_3d ** 2, atol=1e-6, rtol=1e-6)

    print("KERNEL_OK")
</pallas_src>

<mosaic_0001>
module attributes {stable_mosaic.version = 11 : i64} {
  func.func @_square_kernel(%arg0: memref<8x128xf32, #tpu.memory_space<vmem>>, %arg1: memref<8x128xf32, #tpu.memory_space<vmem>>) attributes {dimension_semantics = [], scalar_prefetch = 0 : i64, scratch_operands = 0 : i64, tpu.core_type = #tpu.core_type<tc>} {
    %c0 = arith.constant 0 : index
    %c0_0 = arith.constant 0 : index
    %0 = vector.load %arg0[%c0, %c0_0] : memref<8x128xf32, #tpu.memory_space<vmem>>, vector<8x128xf32>
    %1 = arith.mulf %0, %0 : vector<8x128xf32>
    %c0_1 = arith.constant 0 : index
    %c0_2 = arith.constant 0 : index
    %2 = vector.load %arg1[%c0_1, %c0_2] : memref<8x128xf32, #tpu.memory_space<vmem>>, vector<8x128xf32>
    tpu.vector_store %arg1[%c0_1, %c0_2], %1 {strides = array<i32>} : memref<8x128xf32, #tpu.memory_space<vmem>>, vector<8x128xf32>,
    return
  }
}

</mosaic_0001>

<bundles_post_ra>
// kernel: tpu_custom_call.1
= control target key start
LH: loop header
LB: loop body
LE: loop exit
PB: predicated region body
PF: predicated region fallthrough
CT: control target
= control target key end

     0   :  { %6 = vsyncpa [#allocation3], 0  ;;  %s115_s0 = inlined_call_operand.hbm [shape: f32[8,128], index: 0, kind: input, shape index: {}]   ;;  %s116_s1 = inlined_call_operand.hbm [shape: f32[8,128], index: 1, kind: output, shape index: {}]  }
   0x1   :  { %7 = vsyncpa [#allocation4], 0  ;;  %s13_s8 = sshll.u32 %s115_s0, 4  ;;  %s97_s9 = smov [#allocation2]   ;;  %s14_s8 = int_to_ptr.hbm [resolvable:$true] %s13_s8 }
   0x2   :  { %s15_s10 = sshll.u32 %s97_s9, 4  ;;  %s16_s10 = int_to_ptr.vmem [resolvable:$true] %s15_s10 }
   0x3   :  { %18 = dma.hbm_to_vmem [thread:$0]  %s14_s8, 128, %s16_s10, [#allocation3]  }
   0x4   :  { %93 = dma.done.wait [#allocation3], 128  }
   0x5   :  { %94 = vsyncadd [#allocation3], 4294967168  ;;  %s98_s11 = smov [#allocation5]   ;;  %s33_s15 = sshll.u32 %s116_s1, 4  ;;  %v23_v0 = vld [vmem:[#allocation2] sm:$0xff]  ;;  %s34_s15 = int_to_ptr.hbm [resolvable:$true] %s33_s15 }
   0x6   :  { %s31_s12 = sshll.u32 %s98_s11, 4  ;;  %v24_v1 = vmul.f32 %v23_v0, %v23_v0  ;;  %s32_s12 = int_to_ptr.vmem [resolvable:$true] %s31_s12 }
   0x8   :  { %25 = vst [vmem:[#allocation5] sm:$0xff] %v24_v1 }
   0x9   :  { %36 = dma.vmem_to_hbm [thread:$0]  %s32_s12, 128, %s34_s15, [#allocation4]  }
   0xa   :  { %95 = dma.done.wait [#allocation4], 128  }
   0xb   :  { %96 = vsyncadd [#allocation4], 4294967168 }
   0xc   :  { %41 = vsyncpa [#allocation3], 1 }
   0xd   :  { %42 = vsyncpa [#allocation4], 1 }

</bundles_post_ra>
